<compile_context>
chip_gen: v5e
topology: v5e:2x2
jax: 0.10.0
libtpu: 0.0.40
codegen_flags: <defaults>
</compile_context>

<pallas_src>
import functools

import jax
import jax.numpy as jnp
from jax.experimental import pallas as pl
from jax.experimental.pallas import tpu as pltpu

_LANE = 128      # vreg lane width (last dim)
_SUBLANE = 8     # vreg sublane width (second-last dim, f32)


def _ceil_to(x, m):
    return -(-x // m) * m


# ----------------------------------------------------------------------------
# Pallas kernel: copy the leading window of the last dim.
# ----------------------------------------------------------------------------
def _downsample_kernel(x_ref, o_ref):
    # Tiled path: in/out blocks match -> straight whole-ref copy.
    # Single-step path: the input block may carry up to 127 lane-padding
    # columns (round_up(out_len, 128) - out_len); drop them with a static,
    # offset-0 slice (no cross-lane data movement).
    o_ref[...] = x_ref[...][..., : o_ref.shape[-1]]


def downsample(x, output_size, *, block_cap_bytes=2 * 1024 * 1024):
    """x: (B, C, L) -> x[:, :, :output_size] as a Pallas copy kernel."""
    B, C, L = x.shape
    out_len = min(int(output_size), L)          # torch slice semantics
    itemsize = jnp.dtype(x.dtype).itemsize

    # Input lanes actually needed: never DMA the tail past the last vreg
    # column that contributes to the output.
    in_needed = min(L, _ceil_to(out_len, _LANE))

    if B * C * in_needed * itemsize <= block_cap_bytes:
        # ------------------------------------------------------------------
        # Default path: ONE grid step, one input DMA, one lane-dense output
        # DMA.  Block shapes are either full array dims or 128-multiples, so
        # the (8,128) rule holds for any C / output_size.
        # ------------------------------------------------------------------
        grid = (1,)
        in_specs = [pl.BlockSpec((B, C, in_needed), lambda i: (0, 0, 0))]
        out_specs = pl.BlockSpec((B, C, out_len), lambda i: (0, 0, 0))
        dim_sem = ("arbitrary",)                # single step; nothing to split
    else:
        # ------------------------------------------------------------------
        # VMEM-budget fallback for large B*C*L: tile channels / lanes so each
        # block is ~block_cap_bytes (>= 256 KiB, multiples of (8,128)).
        # ------------------------------------------------------------------
        rows = B * C
        tl = (block_cap_bytes // (rows * itemsize)) // _LANE * _LANE
        if tl >= _LANE:
            tc = C                               # full-C rows, tile lanes only
            tl = min(tl, in_needed)
        else:
            tl = _LANE                           # rows too many: tile C as well
            tc = (block_cap_bytes // (B * tl * itemsize)) // _SUBLANE * _SUBLANE
            tc = max(_SUBLANE, min(tc, C))
            if tc != C and C % _SUBLANE != 0:
                tc = C                           # keep the (8,128) rule intact
        grid = (pl.cdiv(C, tc), pl.cdiv(out_len, tl))
        in_specs = [pl.BlockSpec((B, tc, tl), lambda c, j: (0, c, j))]
        out_specs = pl.BlockSpec((B, tc, tl), lambda c, j: (0, c, j))
        # Both axes are independent; Pallas masks the partial edge blocks of
        # the output.  (On v7x, CORE_PARALLEL on an axis would force the
        # second TensorCore to take half the blocks.)
        dim_sem = ("parallel", "parallel")

    return pl.pallas_call(
        _downsample_kernel,
        out_shape=jax.ShapeDtypeStruct((B, C, out_len), x.dtype),
        grid=grid,
        in_specs=in_specs,
        out_specs=out_specs,
        compiler_params=pltpu.CompilerParams(dimension_semantics=dim_sem),
    )(x)


# ----------------------------------------------------------------------------
if __name__ == "__main__":
    key = jax.random.PRNGKey(0)
    k1, k2, k3 = jax.random.split(key, 3)

    # 1) Small shapes consistent with the module (Conv1d-style (B, C, W)).
    B, C, L = 2, 4, 16
    output_size = 8
    x = jax.random.normal(k1, (B, C, L), jnp.float32)
    out = jax.jit(functools.partial(downsample, output_size=output_size))(x)
    jax.block_until_ready(out)
    assert out.shape == (B, C, output_size), out.shape
    assert bool(jnp.array_equal(out, x[:, :, :output_size]))

    # 2) The configuration the surrounding net uses: Downsample(output_size=484).
    #    B*C*L f32 = 128 KiB -> single grid step, one DMA in / one DMA out.
    x2 = jax.random.normal(k2, (2, 32, 512), jnp.float32)
    out2 = jax.jit(functools.partial(downsample, output_size=484))(x2)
    jax.block_until_ready(out2)
    assert out2.shape == (2, 32, 484), out2.shape
    assert bool(jnp.array_equal(out2, x2[:, :, :484]))

    # 3) Exercise the tiled fallback (forced with a tiny block cap) including a
    #    masked partial edge block on the 400-wide output.
    x3 = jax.random.normal(k3, (2, 16, 512), jnp.float32)
    out3 = jax.jit(functools.partial(downsample, output_size=400,
                                     block_cap_bytes=16 * 1024))(x3)
    jax.block_until_ready(out3)
    assert out3.shape == (2, 16, 400), out3.shape
    assert bool(jnp.array_equal(out3, x3[:, :, :400]))

    print("KERNEL_OK")
</pallas_src>

<mosaic_0001>
module attributes {stable_mosaic.version = 11 : i64} {
  func.func @_downsample_kernel(%arg0: i32, %arg1: memref<2x4x16xf32, #tpu.memory_space<vmem>>, %arg2: memref<2x4x8xf32, #tpu.memory_space<vmem>>) attributes {dimension_semantics = [#tpu.dimension_semantics<arbitrary>], iteration_bounds = array<i64: 1>, scalar_prefetch = 0 : i64, scratch_operands = 0 : i64, tpu.core_type = #tpu.core_type<tc>, window_params = [{pipeline_mode = #tpu.pipeline_mode<synchronous>, transform_indices = @transform_0, window_bounds = array<i64: 2, 4, 16>}, {pipeline_mode = #tpu.pipeline_mode<synchronous>, transform_indices = @transform_1, window_bounds = array<i64: 2, 4, 8>}]} {
    %c0 = arith.constant 0 : index
    %c0_0 = arith.constant 0 : index
    %c0_1 = arith.constant 0 : index
    %0 = vector.load %arg1[%c0, %c0_0, %c0_1] : memref<2x4x16xf32, #tpu.memory_space<vmem>>, vector<2x4x16xf32>
    %1 = vector.extract_strided_slice %0 {offsets = [0, 0, 0], sizes = [2, 4, 8], strides = [1, 1, 1]} : vector<2x4x16xf32> to vector<2x4x8xf32>
    %c0_2 = arith.constant 0 : index
    %c0_3 = arith.constant 0 : index
    %c0_4 = arith.constant 0 : index
    %2 = vector.load %arg2[%c0_2, %c0_3, %c0_4] : memref<2x4x8xf32, #tpu.memory_space<vmem>>, vector<2x4x8xf32>
    tpu.vector_store %arg2[%c0_2, %c0_3, %c0_4], %1 {strides = array<i32>} : memref<2x4x8xf32, #tpu.memory_space<vmem>>, vector<2x4x8xf32>,
    return
  }
  func.func @transform_0(%arg0: i32) -> (i32, i32, i32) {
    %c0_i32 = arith.constant 0 : i32
    %c0_i32_0 = arith.constant 0 : i32
    %c0_i32_1 = arith.constant 0 : i32
    %c0_i32_2 = arith.constant 0 : i32
    return %c0_i32, %c0_i32_0, %c0_i32_1 : i32, i32, i32
  }
  func.func @transform_1(%arg0: i32) -> (i32, i32, i32) {
    %c0_i32 = arith.constant 0 : i32
    %c0_i32_0 = arith.constant 0 : i32
    %c0_i32_1 = arith.constant 0 : i32
    %c0_i32_2 = arith.constant 0 : i32
    return %c0_i32, %c0_i32_0, %c0_i32_1 : i32, i32, i32
  }
}

</mosaic_0001>

<bundles_post_ra>
// kernel: downsample.1
= control target key start
LH: loop header
LB: loop body
LE: loop exit
PB: predicated region body
PF: predicated region fallthrough
CT: control target
= control target key end

     0   :  { %6 = vsyncpa [#allocation3], 0  ;;  %s125_s0 = inlined_call_operand.hbm [shape: f32[2,4,16], index: 0, kind: input, shape index: {}]   ;;  %s126_s1 = inlined_call_operand.hbm [shape: f32[2,4,8], index: 1, kind: output, shape index: {}]  }
   0x1   :  { %7 = vsyncpa [#allocation4], 0  ;;  %s12_s8 = sshll.u32 %s125_s0, 4  ;;  %s105_s9 = smov [#allocation2]   ;;  %s13_s8 = int_to_ptr.hbm [resolvable:$true] %s12_s8 }
   0x2   :  { %s14_s10 = sshll.u32 %s105_s9, 4  ;;  %s106_s11 = smov 64   ;;  %s15_s10 = int_to_ptr.vmem [resolvable:$true] %s14_s10 }
   0x3   :  { %s107_s12 = smov 4  }
   0x4   :  { %20 = dma.hbm_to_vmem [thread:$0]  %s13_s8, 128, %s15_s10, [#allocation3], %s106_s11, %s106_s11, %s107_s12  }
   0x5   :  { %101 = dma.done.wait [#allocation3], 128  }
   0x6   :  { %102 = vsyncadd [#allocation3], 4294967168  ;;  %s108_s13 = smov [#allocation5]   ;;  %s36_s17 = sshll.u32 %s126_s1, 4  ;;  %vm27_vm0 = vcmask 60416   ;;  %s37_s17 = int_to_ptr.hbm [resolvable:$true] %s36_s17 }
   0x7   :  { %s34_s14 = sshll.u32 %s108_s13, 4  ;;  %v25_v0 = vld [vmem:[#allocation2] sm:$0xf]  ;;  %v26_v1 = vld [vmem:[#allocation2 + $0x4] sm:$0xf]  ;;  %s35_s14 = int_to_ptr.vmem [resolvable:$true] %s34_s14 }
   0x8   :  { %28 = vst.msk [vmem:[#allocation5] sm:$0xf] %vm27_vm0, %v25_v0 }
   0x9   :  { %29 = vst.msk [vmem:[#allocation5 + $0x4] sm:$0xf] %vm27_vm0, %v26_v1 }
   0xa   :  { %42 = dma.vmem_to_hbm [thread:$0]  %s35_s14, 128, %s37_s17, [#allocation4], %s106_s11, %s106_s11, %s107_s12  }
   0xb   :  { %103 = dma.done.wait [#allocation4], 128  }
   0xc   :  { %104 = vsyncadd [#allocation4], 4294967168 }
   0xd   :  { %47 = vsyncpa [#allocation3], 1 }
   0xe   :  { %48 = vsyncpa [#allocation4], 1 }

</bundles_post_ra>
